<compile_context>
chip_gen: v6e
topology: v6e:2x2x1
jax: 0.10.0
libtpu: 0.0.40
codegen_flags: <defaults>
</compile_context>

<pallas_src>
import math
import functools

import jax
import jax.numpy as jnp
from jax import lax
from jax.experimental import pallas as pl
from jax.experimental.pallas import tpu as pltpu


def _round_up(x, m):
    return ((x + m - 1) // m) * m


def _pick_tile(dim_pad, t_max, align):
    """Largest multiple of `align` <= min(t_max, dim_pad) that divides dim_pad."""
    t = max(align, (min(t_max, dim_pad) // align) * align)
    while t > align and dim_pad % t != 0:
        t -= align
    return t


def noisy_linear_kernel(precision, x_ref, xfi_ref, mw_ref, sw_ref,
                        bias_ref, fj_ref, o_ref, acc_std):
    """One (tm, tn) output tile, accumulated over the K (In) grid axis."""
    k = pl.program_id(2)

    @pl.when(k == 0)
    def _init():
        # Output block is VMEM-resident across the K axis (index_map ignores k):
        # seed it with the noisy bias row, accumulate the mean path into it.
        o_ref[...] = jnp.broadcast_to(bias_ref[...], o_ref.shape)
        acc_std[...] = jnp.zeros_like(acc_std)

    dn = (((1,), (1,)), ((), ()))          # contract K with K -> no XLU transpose
    o_ref[...] += lax.dot_general(
        x_ref[...], mw_ref[...], dn,
        preferred_element_type=jnp.float32, precision=precision)
    acc_std[...] += lax.dot_general(
        xfi_ref[...], sw_ref[...], dn,
        preferred_element_type=jnp.float32, precision=precision)

    @pl.when(k == pl.num_programs(2) - 1)
    def _finalize():
        # fj is a lane-aligned (1, tn) row scale applied once, at the last K step.
        o_ref[...] += fj_ref[...] * acc_std[...]


@functools.partial(jax.jit,
                   static_argnames=("tm_max", "tn_max", "tk_max", "stream_bf16"))
def noisy_linear(x, mean_w, std_w, mean_b, std_b, key, *,
                 tm_max=256, tn_max=512, tk_max=1024, stream_bf16=False):
    """x: (B, In). mean_w/std_w: (Out, In). mean_b/std_b: (Out,)."""
    B, In = x.shape
    Out = mean_w.shape[0]

    # ---- factorized noise (same sampling / key-split order as the reference) ----
    k_i, k_j = jax.random.split(key)
    ei = jax.random.normal(k_i, (1, In), dtype=jnp.float32)
    ej = jax.random.normal(k_j, (Out, 1), dtype=jnp.float32)
    f = lambda e: jnp.sign(e) * jnp.sqrt(jnp.abs(e))
    fi = f(ei)                                                    # (1, In)
    fj_row = f(ej).reshape(1, Out)                                # (1, Out)
    bias_row = mean_b.reshape(1, Out) + std_b.reshape(1, Out) * fj_row  # f32

    xf32 = x.astype(jnp.float32)
    xfi = xf32 * fi            # hoisted out of the per-K-step kernel body

    stream_dtype = jnp.bfloat16 if stream_bf16 else jnp.float32
    itemsize = 2 if stream_bf16 else 4
    precision = lax.Precision.DEFAULT if stream_bf16 else lax.Precision.HIGHEST

    # ---- tile selection: big tiles, budgeted against v7x's 64 MiB physical VMEM ----
    B_8, Out_128, In_128 = _round_up(B, 8), _round_up(Out, 128), _round_up(In, 128)
    vmem_budget = 40 * 1024 * 1024

    def footprint(tm, tn, tk):
        return (2 * 2 * tm * tk * itemsize      # x, x*fi   (double-buffered)
                + 2 * 2 * tn * tk * itemsize    # mean_w, std_w
                + 2 * tm * tn * 4               # resident output block
                + tm * tn * 4                   # std-path accumulator scratch
                + 4 * 2 * tn * 4)               # bias / f(ej) rows (tiny)

    while True:
        tm = _pick_tile(B_8, tm_max, 8)
        tn = _pick_tile(Out_128, tn_max, 128)
        tk = _pick_tile(In_128, tk_max, 128)
        if footprint(tm, tn, tk) <= vmem_budget:
            break
        if tk_max > 128:
            tk_max //= 2
        elif tn_max > 128:
            tn_max //= 2
        elif tm_max > 8:
            tm_max //= 2
        else:
            break

    B_p = _round_up(B, tm)
    Out_p = _round_up(Out, tn)
    In_p = _round_up(In, tk)

    # v7x has 2 TensorCores: if the parallel extent collapsed to one tile (small B),
    # split the Out axis so both cores get work.
    if (B_p // tm) * (Out_p // tn) == 1 and Out_p >= 256:
        t = (Out_p // 2) // 128 * 128
        while Out_p % t:
            t -= 128
        tn = t
        Out_p = _round_up(Out, tn)

    num_m, num_n, num_k = B_p // tm, Out_p // tn, In_p // tk

    pad2 = lambda a, r, c: jnp.pad(a, ((0, r - a.shape[0]), (0, c - a.shape[1])))
    x_p = pad2(xf32, B_p, In_p).astype(stream_dtype)
    xfi_p = pad2(xfi, B_p, In_p).astype(stream_dtype)
    mw_p = pad2(mean_w.astype(jnp.float32), Out_p, In_p).astype(stream_dtype)
    sw_p = pad2(std_w.astype(jnp.float32), Out_p, In_p).astype(stream_dtype)
    bias_p = pad2(bias_row, 1, Out_p)           # stays f32
    fj_p = pad2(fj_row, 1, Out_p)               # stays f32

    vmem_limit = int(min(max(footprint(tm, tn, tk) + (8 << 20), 32 << 20), 48 << 20))

    cost = pl.CostEstimate(
        flops=4 * B_p * Out_p * In_p,
        transcendentals=0,
        bytes_accessed=(num_m * 2 * Out_p * In_p * itemsize   # weights re-streamed per M tile
                        + num_n * 2 * B_p * In_p * itemsize   # x, x*fi re-streamed per N tile
                        + B_p * Out_p * 4),
    )

    out_p = pl.pallas_call(
        functools.partial(noisy_linear_kernel, precision),
        out_shape=jax.ShapeDtypeStruct((B_p, Out_p), jnp.float32),
        grid_spec=pltpu.PrefetchScalarGridSpec(
            num_scalar_prefetch=0,
            grid=(num_m, num_n, num_k),
            in_specs=[
                pl.BlockSpec((tm, tk), lambda i, j, k: (i, k)),   # x
                pl.BlockSpec((tm, tk), lambda i, j, k: (i, k)),   # x * f(ei)
                pl.BlockSpec((tn, tk), lambda i, j, k: (j, k)),   # mean_w
                pl.BlockSpec((tn, tk), lambda i, j, k: (j, k)),   # std_w
                pl.BlockSpec((1, tn), lambda i, j, k: (0, j)),    # noisy bias row
                pl.BlockSpec((1, tn), lambda i, j, k: (0, j)),    # f(ej) row
            ],
            out_specs=pl.BlockSpec((tm, tn), lambda i, j, k: (i, j)),
            scratch_shapes=[pltpu.VMEM((tm, tn), jnp.float32)],   # std-path accumulator
        ),
        compiler_params=pltpu.CompilerParams(
            dimension_semantics=("parallel", "parallel", "arbitrary"),
            vmem_limit_bytes=vmem_limit,
        ),
        cost_estimate=cost,
    )(x_p, xfi_p, mw_p, sw_p, bias_p, fj_p)

    return out_p[:B, :Out].astype(x.dtype)


def init_params(key, in_features, out_features):
    bound = 1.0 / math.sqrt(in_features)
    k_w, k_b = jax.random.split(key)
    mean_w = jax.random.uniform(k_w, (out_features, in_features),
                                minval=-bound, maxval=bound, dtype=jnp.float32)
    mean_b = jax.random.uniform(k_b, (out_features,),
                                minval=-bound, maxval=bound, dtype=jnp.float32)
    std_w = jnp.full((out_features, in_features), 0.5 * bound, dtype=jnp.float32)
    std_b = jnp.full((out_features,), 0.5 * bound, dtype=jnp.float32)
    return mean_w, std_w, mean_b, std_b


def reference(x, mean_w, std_w, mean_b, std_b, noise_key):
    k_i, k_j = jax.random.split(noise_key)
    ei = jax.random.normal(k_i, (1, x.shape[1]), dtype=jnp.float32)
    ej = jax.random.normal(k_j, (mean_w.shape[0], 1), dtype=jnp.float32)
    f = lambda e: jnp.sign(e) * jnp.sqrt(jnp.abs(e))
    w = mean_w + std_w * (f(ej) * f(ei))
    b = mean_b + std_b * f(ej)[:, 0]
    return x @ w.T + b[None, :]


if __name__ == "__main__":
    key = jax.random.PRNGKey(0)
    k_param, k_x, k_noise, k_param2, k_x2, k_noise2 = jax.random.split(key, 6)

    # --- test 1: tiny shape, f32 streaming (bit-comparable path) ---
    B, In, Out = 4, 32, 16
    mw, sw, mb, sb = init_params(k_param, In, Out)
    x = jax.random.normal(k_x, (B, In), dtype=jnp.float32)
    out = jax.block_until_ready(noisy_linear(x, mw, sw, mb, sb, k_noise))
    ref = reference(x, mw, sw, mb, sb, k_noise)
    assert out.shape == (B, Out)
    assert jnp.allclose(out, ref, atol=1e-5, rtol=1e-5)

    # --- test 2: multi-tile grid (exercises M/N/K tiling and K accumulation) ---
    B2, In2, Out2 = 12, 384, 256
    mw2, sw2, mb2, sb2 = init_params(k_param2, In2, Out2)
    x2 = jax.random.normal(k_x2, (B2, In2), dtype=jnp.float32)
    out2 = jax.block_until_ready(
        noisy_linear(x2, mw2, sw2, mb2, sb2, k_noise2,
                     tm_max=8, tn_max=128, tk_max=128))
    ref2 = reference(x2, mw2, sw2, mb2, sb2, k_noise2)
    assert jnp.allclose(out2, ref2, atol=1e-4, rtol=1e-4)

    # --- test 3: bf16 weight/activation streaming (HBM-bound fast path) ---
    out3 = jax.block_until_ready(
        noisy_linear(x2, mw2, sw2, mb2, sb2, k_noise2, stream_bf16=True))
    assert jnp.allclose(out3, ref2, atol=3e-2, rtol=3e-2)

    print("KERNEL_OK")
</pallas_src>

<mosaic_0001>
module attributes {stable_mosaic.version = 11 : i64} {
  func.func @noisy_linear_kernel(%arg0: i32, %arg1: i32, %arg2: i32, %arg3: memref<8x128xf32, #tpu.memory_space<vmem>>, %arg4: memref<8x128xf32, #tpu.memory_space<vmem>>, %arg5: memref<128x128xf32, #tpu.memory_space<vmem>>, %arg6: memref<128x128xf32, #tpu.memory_space<vmem>>, %arg7: memref<1x128xf32, #tpu.memory_space<vmem>>, %arg8: memref<1x128xf32, #tpu.memory_space<vmem>>, %arg9: memref<8x128xf32, #tpu.memory_space<vmem>>, %arg10: memref<8x128xf32, #tpu.memory_space<vmem>>) attributes {dimension_semantics = [#tpu.dimension_semantics<parallel>, #tpu.dimension_semantics<parallel>, #tpu.dimension_semantics<arbitrary>], iteration_bounds = array<i64: 1, 1, 1>, scalar_prefetch = 0 : i64, scratch_operands = 1 : i64, tpu.core_type = #tpu.core_type<tc>, window_params = [{transform_indices = @transform_0, window_bounds = array<i64: 8, 128>}, {transform_indices = @transform_1, window_bounds = array<i64: 8, 128>}, {transform_indices = @transform_2, window_bounds = array<i64: 128, 128>}, {transform_indices = @transform_3, window_bounds = array<i64: 128, 128>}, {transform_indices = @transform_4, window_bounds = array<i64: 1, 128>}, {transform_indices = @transform_5, window_bounds = array<i64: 1, 128>}, {transform_indices = @transform_6, window_bounds = array<i64: 8, 128>}]} {
    %c0_i32 = arith.constant 0 : i32
    %0 = arith.cmpi eq, %arg2, %c0_i32 : i32
    %1 = arith.extui %0 : i1 to i32
    %c0_i32_0 = arith.constant 0 : i32
    %2 = arith.cmpi ne, %1, %c0_i32_0 : i32
    scf.if %2 {
      %c0_19 = arith.constant 0 : index
      %c0_20 = arith.constant 0 : index
      %18 = vector.load %arg7[%c0_19, %c0_20] : memref<1x128xf32, #tpu.memory_space<vmem>>, vector<1x128xf32>
      %19 = vector.shape_cast %18 : vector<1x128xf32> to vector<1x128xf32>
      %20 = vector.broadcast %19 : vector<1x128xf32> to vector<8x128xf32>
      %c0_21 = arith.constant 0 : index
      %c0_22 = arith.constant 0 : index
      %21 = vector.load %arg9[%c0_21, %c0_22] : memref<8x128xf32, #tpu.memory_space<vmem>>, vector<8x128xf32>
      tpu.vector_store %arg9[%c0_21, %c0_22], %20 {strides = array<i32>} : memref<8x128xf32, #tpu.memory_space<vmem>>, vector<8x128xf32>,
      %cst_23 = arith.constant 0.000000e+00 : f32
      %22 = vector.broadcast %cst_23 : f32 to vector<8x128xf32>
      %c0_24 = arith.constant 0 : index
      %c0_25 = arith.constant 0 : index
      %23 = vector.load %arg10[%c0_24, %c0_25] : memref<8x128xf32, #tpu.memory_space<vmem>>, vector<8x128xf32>
      tpu.vector_store %arg10[%c0_24, %c0_25], %22 {strides = array<i32>} : memref<8x128xf32, #tpu.memory_space<vmem>>, vector<8x128xf32>,
    } else {
    }
    %c0 = arith.constant 0 : index
    %c0_1 = arith.constant 0 : index
    %3 = vector.load %arg9[%c0, %c0_1] : memref<8x128xf32, #tpu.memory_space<vmem>>, vector<8x128xf32>
    %c0_2 = arith.constant 0 : index
    %c0_3 = arith.constant 0 : index
    %4 = vector.load %arg3[%c0_2, %c0_3] : memref<8x128xf32, #tpu.memory_space<vmem>>, vector<8x128xf32>
    %c0_4 = arith.constant 0 : index
    %c0_5 = arith.constant 0 : index
    %5 = vector.load %arg5[%c0_4, %c0_5] : memref<128x128xf32, #tpu.memory_space<vmem>>, vector<128x128xf32>
    %cst = arith.constant dense<0.000000e+00> : vector<8x128xf32>
    %6 = tpu.matmul %4, %5, %cst {dimension_numbers = #tpu.dot_dimension_numbers<[1], [1], [0], [0], [0, 0, 1, 0], [], []>, precision = #tpu.contract_precision<fp32>} : vector<8x128xf32>, vector<128x128xf32>, vector<8x128xf32> -> vector<8x128xf32>
    %7 = arith.addf %3, %6 : vector<8x128xf32>
    %c0_6 = arith.constant 0 : index
    %c0_7 = arith.constant 0 : index
    %8 = vector.load %arg9[%c0_6, %c0_7] : memref<8x128xf32, #tpu.memory_space<vmem>>, vector<8x128xf32>
    tpu.vector_store %arg9[%c0_6, %c0_7], %7 {strides = array<i32>} : memref<8x128xf32, #tpu.memory_space<vmem>>, vector<8x128xf32>,
    %c0_8 = arith.constant 0 : index
    %c0_9 = arith.constant 0 : index
    %9 = vector.load %arg10[%c0_8, %c0_9] : memref<8x128xf32, #tpu.memory_space<vmem>>, vector<8x128xf32>
    %c0_10 = arith.constant 0 : index
    %c0_11 = arith.constant 0 : index
    %10 = vector.load %arg4[%c0_10, %c0_11] : memref<8x128xf32, #tpu.memory_space<vmem>>, vector<8x128xf32>
    %c0_12 = arith.constant 0 : index
    %c0_13 = arith.constant 0 : index
    %11 = vector.load %arg6[%c0_12, %c0_13] : memref<128x128xf32, #tpu.memory_space<vmem>>, vector<128x128xf32>
    %cst_14 = arith.constant dense<0.000000e+00> : vector<8x128xf32>
    %12 = tpu.matmul %10, %11, %cst_14 {dimension_numbers = #tpu.dot_dimension_numbers<[1], [1], [0], [0], [0, 0, 1, 0], [], []>, precision = #tpu.contract_precision<fp32>} : vector<8x128xf32>, vector<128x128xf32>, vector<8x128xf32> -> vector<8x128xf32>
    %13 = arith.addf %9, %12 : vector<8x128xf32>
    %c0_15 = arith.constant 0 : index
    %c0_16 = arith.constant 0 : index
    %14 = vector.load %arg10[%c0_15, %c0_16] : memref<8x128xf32, #tpu.memory_space<vmem>>, vector<8x128xf32>
    tpu.vector_store %arg10[%c0_15, %c0_16], %13 {strides = array<i32>} : memref<8x128xf32, #tpu.memory_space<vmem>>, vector<8x128xf32>,
    %c0_i32_17 = arith.constant 0 : i32
    %15 = arith.cmpi eq, %arg2, %c0_i32_17 : i32
    %16 = arith.extui %15 : i1 to i32
    %c0_i32_18 = arith.constant 0 : i32
    %17 = arith.cmpi ne, %16, %c0_i32_18 : i32
    scf.if %17 {
      %c0_19 = arith.constant 0 : index
      %c0_20 = arith.constant 0 : index
      %18 = vector.load %arg9[%c0_19, %c0_20] : memref<8x128xf32, #tpu.memory_space<vmem>>, vector<8x128xf32>
      %c0_21 = arith.constant 0 : index
      %c0_22 = arith.constant 0 : index
      %19 = vector.load %arg8[%c0_21, %c0_22] : memref<1x128xf32, #tpu.memory_space<vmem>>, vector<1x128xf32>
      %c0_23 = arith.constant 0 : index
      %c0_24 = arith.constant 0 : index
      %20 = vector.load %arg10[%c0_23, %c0_24] : memref<8x128xf32, #tpu.memory_space<vmem>>, vector<8x128xf32>
      %21 = vector.broadcast %19 : vector<1x128xf32> to vector<8x128xf32>
      %22 = arith.mulf %21, %20 : vector<8x128xf32>
      %23 = arith.addf %18, %22 : vector<8x128xf32>
      %c0_25 = arith.constant 0 : index
      %c0_26 = arith.constant 0 : index
      %24 = vector.load %arg9[%c0_25, %c0_26] : memref<8x128xf32, #tpu.memory_space<vmem>>, vector<8x128xf32>
      tpu.vector_store %arg9[%c0_25, %c0_26], %23 {strides = array<i32>} : memref<8x128xf32, #tpu.memory_space<vmem>>, vector<8x128xf32>,
    } else {
    }
    return
  }
  func.func @transform_0(%arg0: i32, %arg1: i32, %arg2: i32) -> (i32, i32) {
    %c0_i32 = arith.constant 0 : i32
    return %arg0, %arg2 : i32, i32
  }
  func.func @transform_1(%arg0: i32, %arg1: i32, %arg2: i32) -> (i32, i32) {
    %c0_i32 = arith.constant 0 : i32
    return %arg0, %arg2 : i32, i32
  }
  func.func @transform_2(%arg0: i32, %arg1: i32, %arg2: i32) -> (i32, i32) {
    %c0_i32 = arith.constant 0 : i32
    return %arg1, %arg2 : i32, i32
  }
  func.func @transform_3(%arg0: i32, %arg1: i32, %arg2: i32) -> (i32, i32) {
    %c0_i32 = arith.constant 0 : i32
    return %arg1, %arg2 : i32, i32
  }
  func.func @transform_4(%arg0: i32, %arg1: i32, %arg2: i32) -> (i32, i32) {
    %c0_i32 = arith.constant 0 : i32
    %c0_i32_0 = arith.constant 0 : i32
    return %c0_i32, %arg1 : i32, i32
  }
  func.func @transform_5(%arg0: i32, %arg1: i32, %arg2: i32) -> (i32, i32) {
    %c0_i32 = arith.constant 0 : i32
    %c0_i32_0 = arith.constant 0 : i32
    return %c0_i32, %arg1 : i32, i32
  }
  func.func @transform_6(%arg0: i32, %arg1: i32, %arg2: i32) -> (i32, i32) {
    %c0_i32 = arith.constant 0 : i32
    return %arg0, %arg1 : i32, i32
  }
}

</mosaic_0001>

<bundles_post_ra>
// kernel: noisy_linear.3
= control target key start
LH: loop header
LB: loop body
LE: loop exit
PB: predicated region body
PF: predicated region fallthrough
CT: control target
= control target key end

     0   :  { %v2005_v0 = vmov 0.0   ;;  %vm2006_vm0 = vmmov 0   ;;  %s2879_s2 = inlined_call_operand.vmem [shape: f32[128,128], index: 2, kind: input, shape index: {}]   ;;  %s2880_s0 = inlined_call_operand.vmem [shape: f32[8,128], index: 0, kind: input, shape index: {}]   ;;  %s2881_s3 = inlined_call_operand.vmem [shape: f32[128,128], index: 3, kind: input, shape index: {}]   ;;  %s2882_s1 = inlined_call_operand.vmem [shape: f32[8,128], index: 1, kind: input, shape index: {}]   ;;  %s2883_s4 = inlined_call_operand.vmem [shape: f32[1,128], index: 4, kind: input, shape index: {}]   ;;  %s2884_s5 = inlined_call_operand.vmem [shape: f32[1,128], index: 5, kind: input, shape index: {}]   ;;  %s2885_s6 = inlined_call_operand.vmem [shape: f32[8,128], index: 6, kind: output, shape index: {}]  }
   0x1   :  { %1583 = vmatprep.subr.mxu0 %v2005_v0  ;;  %v53_v1 = vld [vmem:[%s2879_s2 + $0x78] sm:$0xff]  ;;  %v52_v2 = vld [vmem:[%s2879_s2 + $0x70] sm:$0xff]  ;;  %1618 = vmatprep.subr.mxu1 %v2005_v0  ;;  %v51_v3 = vld [vmem:[%s2879_s2 + $0x68] sm:$0xff] }
   0x2   :  { %v2053_v4 = vand.u32 4294901760, %v53_v1  ;;  %v2055_v5 = vand.u32 4294901760, %v52_v2  ;;  %v2057_v6 = vand.u32 4294901760, %v51_v3  ;;  %v50_v7 = vld [vmem:[%s2879_s2 + $0x60] sm:$0xff]  ;;  %1615 = vmatprep.mubr.msk.f32.mxu0 %vm2006_vm0, %v2005_v0  ;;  %1650 = vmatprep.mubr.msk.f32.mxu1 %vm2006_vm0, %v2005_v0  ;;  %v49_v11 = vld [vmem:[%s2879_s2 + $0x58] sm:$0xff]  ;;  %v48_v19 = vld [vmem:[%s2879_s2 + $0x50] sm:$0xff] }
   0x3   :  { %v2070_v9 = vand.u32 4294901760, %v50_v7  ;;  %v2084_v15 = vand.u32 4294901760, %v49_v11  ;;  %v2101_v22 = vand.u32 4294901760, %v48_v19  ;;  %v47_v26 = vld [vmem:[%s2879_s2 + $0x48] sm:$0xff]  ;;  %v46_v32 = vld [vmem:[%s2879_s2 + $0x40] sm:$0xff]  ;;  %v45_v38 = vld [vmem:[%s2879_s2 + $0x38] sm:$0xff] }
   0x4   :  { %1584 = vmatpush3.xpose.msra.mxu0 %v2053_v4  ;;  %v2068_v8 = vsub.f32 %v53_v1, %v2053_v4  ;;  %v2073_v10 = vsub.f32 %v52_v2, %v2055_v5  ;;  %v2079_v12 = vsub.f32 %v51_v3, %v2057_v6  ;;  %v2116_v28 = vand.u32 4294901760, %v47_v26  ;;  %v44_v44 = vld [vmem:[%s2879_s2 + $0x30] sm:$0xff]  ;;  %v43_v50 = vld [vmem:[%s2879_s2 + $0x28] sm:$0xff]  ;;  %v42_v56 = vld [vmem:[%s2879_s2 + $0x20] sm:$0xff] }
   0x5   :  { %1585 = vmatprep.subr.mxu0 %v2005_v0  ;;  %v2098_v20 = vsub.f32 %v50_v7, %v2070_v9  ;;  %v2112_v27 = vsub.f32 %v49_v11, %v2084_v15  ;;  %v2127_v33 = vsub.f32 %v48_v19, %v2101_v22  ;;  %v2131_v34 = vand.u32 4294901760, %v46_v32  ;;  %v41_v62 = vld [vmem:[%s2879_s2 + $0x18] sm:$0xff]  ;;  %v40_v11 = vld [vmem:[%s2879_s2 + $0x10] sm:$0xff] }
   0x6   :  { %v148_v13 = vand.u32 4294901760, %v2068_v8  ;;  %v155_v14 = vand.u32 4294901760, %v2073_v10  ;;  %v162_v18 = vand.u32 4294901760, %v2079_v12  ;;  %v2142_v39 = vsub.f32 %v47_v26, %v2116_v28 }
   0x7   :  { %v169_v25 = vand.u32 4294901760, %v2098_v20  ;;  %v176_v31 = vand.u32 4294901760, %v2112_v27  ;;  %v183_v37 = vand.u32 4294901760, %v2127_v33  ;;  %v2146_v40 = vand.u32 4294901760, %v45_v38 }
   0x8   :  { %1586 = vmatpush3.xpose.msra.mxu0 %v2055_v5  ;;  %v149_v16 = vsub.f32 %v2068_v8, %v148_v13  ;;  %v156_v17 = vsub.f32 %v2073_v10, %v155_v14  ;;  %v163_v24 = vsub.f32 %v2079_v12, %v162_v18  ;;  %v190_v43 = vand.u32 4294901760, %v2142_v39 }
   0x9   :  { %1587 = vmatprep.subr.mxu0 %v2005_v0  ;;  %v170_v30 = vsub.f32 %v2098_v20, %v169_v25  ;;  %v177_v36 = vsub.f32 %v2112_v27, %v176_v31  ;;  %v184_v42 = vsub.f32 %v2127_v33, %v183_v37  ;;  %v2157_v45 = vsub.f32 %v46_v32, %v2131_v34 }
   0xa   :  { %v150_v21 = vand.u32 4294901760, %v149_v16  ;;  %v157_v23 = vand.u32 4294901760, %v156_v17  ;;  %v164_v29 = vand.u32 4294901760, %v163_v24  ;;  %v2161_v46 = vand.u32 4294901760, %v44_v44  ;;  %v39_v24 = vld [vmem:[%s2879_s2 + $0x8] sm:$0xff] }
   0xb   :  { %v171_v35 = vand.u32 4294901760, %v170_v30  ;;  %v178_v41 = vand.u32 4294901760, %v177_v36  ;;  %v185_v47 = vand.u32 4294901760, %v184_v42  ;;  %v191_v48 = vsub.f32 %v2142_v39, %v190_v43 }
   0xc   :  { %1588 = vmatpush3.xpose.msra.mxu0 %v2057_v6  ;;  %1619 = vmatpush3.xpose.msra.mxu1 %v150_v21  ;;  %v197_v49 = vand.u32 4294901760, %v2157_v45  ;;  %v2172_v51 = vsub.f32 %v45_v38, %v2146_v40  ;;  %v2176_v52 = vand.u32 4294901760, %v43_v50  ;;  %v2187_v57 = vsub.f32 %v44_v44, %v2161_v46 }
   0xd   :  { %1589 = vmatprep.subr.mxu0 %v2005_v0  ;;  %1620 = vmatprep.subr.mxu1 %v2005_v0  ;;  %v192_v53 = vand.u32 4294901760, %v191_v48  ;;  %v2191_v58 = vand.u32 4294901760, %v42_v56  ;;  %v2206_v1 = vand.u32 4294901760, %v41_v62  ;;  %v2221_v17 = vand.u32 4294901760, %v40_v11 }
   0xe   :  { %v198_v54 = vsub.f32 %v2157_v45, %v197_v49  ;;  %v204_v55 = vand.u32 4294901760, %v2172_v51  ;;  %v211_v61 = vand.u32 4294901760, %v2187_v57  ;;  %v2202_v63 = vsub.f32 %v43_v50, %v2176_v52 }
   0xf   :  { %v2217_v16 = vsub.f32 %v42_v56, %v2191_v58  ;;  %v2232_v26 = vsub.f32 %v41_v62, %v2206_v1  ;;  %v2239_v30 = vand.u32 4294901760, %v39_v24  ;;  %v2252_v42 = vsub.f32 %v40_v11, %v2221_v17 }
  0x10   :  { %1590 = vmatpush3.xpose.msra.mxu0 %v2070_v9  ;;  %1621 = vmatpush3.xpose.msra.mxu1 %v157_v23  ;;  %v199_v59 = vand.u32 4294901760, %v198_v54  ;;  %v205_v60 = vsub.f32 %v2172_v51, %v204_v55  ;;  %v212_v3 = vsub.f32 %v2187_v57, %v211_v61  ;;  %v218_v7 = vand.u32 4294901760, %v2202_v63 }
  0x11   :  { %1591 = vmatprep.subr.mxu0 %v2005_v0  ;;  %1622 = vmatprep.subr.mxu1 %v2005_v0  ;;  %v225_v23 = vand.u32 4294901760, %v2217_v16  ;;  %v232_v38 = vand.u32 4294901760, %v2232_v26  ;;  %v2267_v54 = vsub.f32 %v39_v24, %v2239_v30 }
  0x12   :  { %v206_v2 = vand.u32 4294901760, %v205_v60  ;;  %v213_v19 = vand.u32 4294901760, %v212_v3  ;;  %v219_v21 = vsub.f32 %v2202_v63, %v218_v7 }
  0x13   :  { %v226_v36 = vsub.f32 %v2217_v16, %v225_v23  ;;  %v233_v50 = vsub.f32 %v2232_v26, %v232_v38  ;;  %v246_v62 = vand.u32 4294901760, %v2267_v54 }
  0x14   :  { %1592 = vmatpush3.xpose.msra.mxu0 %v2084_v15  ;;  %1623 = vmatpush3.xpose.msra.mxu1 %v164_v29  ;;  %v37_v29 = vld [vmem:[%s2880_s0] sm:$0xff] }
  0x15   :  { %1593 = vmatprep.subr.mxu0 %v2005_v0  ;;  %1624 = vmatprep.subr.mxu1 %v2005_v0  ;;  %v2241_v32 = vand.u32 4294901760, %v37_v29  ;;  %v227_v48 = vand.u32 4294901760, %v226_v36 }
  0x18   :  { %1594 = vmatpush3.xpose.msra.mxu0 %v2101_v22  ;;  %1625 = vmatpush3.xpose.msra.mxu1 %v171_v35  ;;  %v220_v35 = vand.u32 4294901760, %v219_v21 }
  0x19   :  { %1595 = vmatprep.subr.mxu0 %v2005_v0  ;;  %1626 = vmatprep.subr.mxu1 %v2005_v0 }
  0x1c   :  { %1596 = vmatpush3.xpose.msra.mxu0 %v2116_v28  ;;  %1627 = vmatpush3.xpose.msra.mxu1 %v178_v41  ;;  %v38_v41 = vld [vmem:[%s2879_s2] sm:$0xff] }
  0x1d   :  { %1597 = vmatprep.subr.mxu0 %v2005_v0  ;;  %1628 = vmatprep.subr.mxu1 %v2005_v0  ;;  %v2256_v44 = vand.u32 4294901760, %v38_v41 }
  0x20   :  { %1598 = vmatpush3.xpose.msra.mxu0 %v2131_v34  ;;  %1629 = vmatpush3.xpose.msra.mxu1 %v185_v47  ;;  %v2259_v47 = vsub.f32 %v37_v29, %v2241_v32 }
  0x21   :  { %1599 = vmatprep.subr.mxu0 %v2005_v0  ;;  %1630 = vmatprep.subr.mxu1 %v2005_v0 }
  0x22   :  { %v137_v56 = vand.u32 4294901760, %v2259_v47 }
  0x24   :  { %1600 = vmatpush3.xpose.msra.mxu0 %v2146_v40  ;;  %1631 = vmatpush3.xpose.msra.mxu1 %v192_v53  ;;  %v239_v53 = vand.u32 4294901760, %v2252_v42  ;;  %v138_v3 = vsub.f32 %v2259_v47, %v137_v56 }
  0x25   :  { %1601 = vmatprep.subr.mxu0 %v2005_v0  ;;  %1632 = vmatprep.subr.mxu1 %v2005_v0 }
  0x26   :  { %v240_v60 = vsub.f32 %v2252_v42, %v239_v53  ;;  %v139_v24 = vand.u32 4294901760, %v138_v3 }
  0x28   :  { %1602 = vmatpush3.xpose.msra.mxu0 %v2161_v46  ;;  %1633 = vmatpush3.xpose.msra.mxu1 %v199_v59  ;;  %v234_v59 = vand.u32 4294901760, %v233_v50  ;;  %v241_v11 = vand.u32 4294901760, %v240_v60 }
  0x29   :  { %1603 = vmatprep.subr.mxu0 %v2005_v0  ;;  %1634 = vmatprep.subr.mxu1 %v2005_v0 }
  0x2c   :  { %1604 = vmatpush3.xpose.msra.mxu0 %v2176_v52  ;;  %1635 = vmatpush3.xpose.msra.mxu1 %v206_v2  ;;  %v2278_v2 = vsub.f32 %v38_v41, %v2256_v44 }
  0x2d   :  { %1605 = vmatprep.subr.mxu0 %v2005_v0  ;;  %1636 = vmatprep.subr.mxu1 %v2005_v0 }
  0x2e   :  { %v253_v21 = vand.u32 4294901760, %v2278_v2 }
  0x30   :  { %1606 = vmatpush3.xpose.msra.mxu0 %v2191_v58  ;;  %1637 = vmatpush3.xpose.msra.mxu1 %v213_v19  ;;  %v247_v19 = vsub.f32 %v2267_v54, %v246_v62 }
  0x31   :  { %1607 = vmatprep.subr.mxu0 %v2005_v0  ;;  %1638 = vmatprep.subr.mxu1 %v2005_v0 }
  0x32   :  { %v248_v29 = vand.u32 4294901760, %v247_v19 }
  0x34   :  { %1608 = vmatpush3.xpose.msra.mxu0 %v2206_v1  ;;  %1639 = vmatpush3.xpose.msra.mxu1 %v220_v35  ;;  %v254_v35 = vsub.f32 %v2278_v2, %v253_v21 }
  0x35   :  { %1609 = vmatprep.subr.mxu0 %v2005_v0  ;;  %1640 = vmatprep.subr.mxu1 %v2005_v0 }
  0x36   :  { %v255_v36 = vand.u32 4294901760, %v254_v35 }
  0x38   :  { %1610 = vmatpush3.xpose.msra.mxu0 %v2221_v17  ;;  %1641 = vmatpush3.xpose.msra.mxu1 %v227_v48 }
  0x39   :  { %1611 = vmatprep.subr.mxu0 %v2005_v0  ;;  %1642 = vmatprep.subr.mxu1 %v2005_v0 }
  0x3c   :  { %1612 = vmatpush3.xpose.msra.mxu0 %v2239_v30  ;;  %1643 = vmatpush3.xpose.msra.mxu1 %v234_v59 }
  0x3d   :  { %1613 = vmatprep.subr.mxu0 %v2005_v0  ;;  %1644 = vmatprep.subr.mxu1 %v2005_v0 }
  0x40   :  { %1614 = vmatpush3.xpose.msra.mxu0 %v2256_v44  ;;  %1645 = vmatpush3.xpose.msra.mxu1 %v241_v11  ;;  %v703_v11 = vld [vmem:[%s2881_s3 + $0x20] sm:$0xff] }
  0x41   :  { %1646 = vmatprep.subr.mxu1 %v2005_v0  ;;  %1653 = vmatprep.subr.mxu0 %v2005_v0  ;;  %v2605_v19 = vand.u32 4294901760, %v703_v11 }
  0x43   :  { %1616 = vmatmul.mubr.f32.vlgmr.msra.gmra.mxu0 %v139_v24 }
  0x44   :  { %1647 = vmatpush3.xpose.msra.mxu1 %v248_v29  ;;  %1654 = vmatpush3.xpose.msra.mxu0 %v2068_v8 }
  0x45   :  { %1648 = vmatprep.subr.mxu1 %v2005_v0  ;;  %1655 = vmatprep.subr.mxu0 %v2005_v0 }
  0x46   :  { %1685 = vmatprep.mubr.msk.f32.mxu0 %vm2006_vm0, %v2005_v0 }
  0x48   :  { %1649 = vmatpush3.xpose.msra.mxu1 %v255_v36  ;;  %1656 = vmatpush3.xpose.msra.mxu0 %v2073_v10  ;;  %v712_v10 = vld [vmem:[%s2881_s3 + $0x68] sm:$0xff]  ;;  %v702_v36 = vld [vmem:[%s2881_s3 + $0x18] sm:$0xff] }
  0x49   :  { %1657 = vmatprep.subr.mxu0 %v2005_v0  ;;  %1688 = vmatprep.subr.mxu1 %v2005_v0 }
  0x4b   :  { %1651 = vmatmul.mubr.f32.vlgmr.msra.gmra.mxu1 %v2241_v32 }
  0x4c   :  { %1658 = vmatpush3.xpose.msra.mxu0 %v2079_v12  ;;  %1689 = vmatpush3.xpose.msra.mxu1 %v2053_v4 }
  0x4d   :  { %1659 = vmatprep.subr.mxu0 %v2005_v0  ;;  %1690 = vmatprep.subr.mxu1 %v2005_v0 }
  0x4e   :  { %1720 = vmatprep.mubr.msk.f32.mxu1 %vm2006_vm0, %v2005_v0 }
  0x50   :  { %1660 = vmatpush3.xpose.msra.mxu0 %v2098_v20  ;;  %1691 = vmatpush3.xpose.msra.mxu1 %v2055_v5 }
  0x51   :  { %1661 = vmatprep.subr.mxu0 %v2005_v0  ;;  %1692 = vmatprep.subr.mxu1 %v2005_v0 }
  0x54   :  { %1662 = vmatpush3.xpose.msra.mxu0 %v2112_v27  ;;  %1693 = vmatpush3.xpose.msra.mxu1 %v2057_v6  ;;  %v710_v27 = vld [vmem:[%s2881_s3 + $0x58] sm:$0xff] }
  0x55   :  { %1663 = vmatprep.subr.mxu0 %v2005_v0  ;;  %1694 = vmatprep.subr.mxu1 %v2005_v0 }
  0x58   :  { %1664 = vmatpush3.xpose.msra.mxu0 %v2127_v33  ;;  %1695 = vmatpush3.xpose.msra.mxu1 %v2070_v9 }
  0x59   :  { %1665 = vmatprep.subr.mxu0 %v2005_v0  ;;  %1696 = vmatprep.subr.mxu1 %v2005_v0 }
  0x5c   :  { %1666 = vmatpush3.xpose.msra.mxu0 %v2142_v39  ;;  %1697 = vmatpush3.xpose.msra.mxu1 %v2084_v15  ;;  %v709_v39 = vld [vmem:[%s2881_s3 + $0x50] sm:$0xff] }
  0x5d   :  { %1667 = vmatprep.subr.mxu0 %v2005_v0  ;;  %1698 = vmatprep.subr.mxu1 %v2005_v0 }
  0x60   :  { %1668 = vmatpush3.xpose.msra.mxu0 %v2157_v45  ;;  %1699 = vmatpush3.xpose.msra.mxu1 %v2101_v22 }
  0x61   :  { %1669 = vmatprep.subr.mxu0 %v2005_v0  ;;  %1700 = vmatprep.subr.mxu1 %v2005_v0 }
  0x64   :  { %1670 = vmatpush3.xpose.msra.mxu0 %v2172_v51  ;;  %1701 = vmatpush3.xpose.msra.mxu1 %v2116_v28  ;;  %v708_v51 = vld [vmem:[%s2881_s3 + $0x48] sm:$0xff] }
  0x65   :  { %1671 = vmatprep.subr.mxu0 %v2005_v0  ;;  %1702 = vmatprep.subr.mxu1 %v2005_v0 }
  0x68   :  { %1672 = vmatpush3.xpose.msra.mxu0 %v2187_v57  ;;  %1703 = vmatpush3.xpose.msra.mxu1 %v2131_v34 }
  0x69   :  { %1673 = vmatprep.subr.mxu0 %v2005_v0  ;;  %1704 = vmatprep.subr.mxu1 %v2005_v0 }
  0x6c   :  { %1674 = vmatpush3.xpose.msra.mxu0 %v2202_v63  ;;  %1705 = vmatpush3.xpose.msra.mxu1 %v2146_v40  ;;  %v707_v63 = vld [vmem:[%s2881_s3 + $0x40] sm:$0xff] }
  0x6d   :  { %1675 = vmatprep.subr.mxu0 %v2005_v0  ;;  %1706 = vmatprep.subr.mxu1 %v2005_v0 }
  0x70   :  { %1676 = vmatpush3.xpose.msra.mxu0 %v2217_v16  ;;  %1707 = vmatpush3.xpose.msra.mxu1 %v2161_v46 }
  0x71   :  { %1677 = vmatprep.subr.mxu0 %v2005_v0  ;;  %1708 = vmatprep.subr.mxu1 %v2005_v0 }
  0x74   :  { %1678 = vmatpush3.xpose.msra.mxu0 %v2232_v26  ;;  %1709 = vmatpush3.xpose.msra.mxu1 %v2176_v52  ;;  %v706_v26 = vld [vmem:[%s2881_s3 + $0x38] sm:$0xff] }
  0x75   :  { %1679 = vmatprep.subr.mxu0 %v2005_v0  ;;  %1710 = vmatprep.subr.mxu1 %v2005_v0 }
  0x78   :  { %1680 = vmatpush3.xpose.msra.mxu0 %v2252_v42  ;;  %1711 = vmatpush3.xpose.msra.mxu1 %v2191_v58  ;;  %v2568_v42 = vand.u32 4294901760, %v706_v26 }
  0x79   :  { %1681 = vmatprep.subr.mxu0 %v2005_v0  ;;  %1712 = vmatprep.subr.mxu1 %v2005_v0 }
  0x7a   :  { %v2580_v50 = vsub.f32 %v706_v26, %v2568_v42 }
  0x7c   :  { %1682 = vmatpush3.xpose.msra.mxu0 %v2267_v54  ;;  %1713 = vmatpush3.xpose.msra.mxu1 %v2206_v1  ;;  %v865_v3 = vand.u32 4294901760, %v2580_v50 }
  0x7d   :  { %1683 = vmatprep.subr.mxu0 %v2005_v0  ;;  %1714 = vmatprep.subr.mxu1 %v2005_v0 }
  0x7e   :  { %v866_v29 = vsub.f32 %v2580_v50, %v865_v3 }
  0x80   :  { %1684 = vmatpush3.xpose.msra.mxu0 %v2278_v2  ;;  %1715 = vmatpush3.xpose.msra.mxu1 %v2221_v17 }
  0x81   :  { %1716 = vmatprep.subr.mxu1 %v2005_v0  ;;  %1723 = vmatprep.subr.mxu0 %v2005_v0 }
  0x83   :  { %1686 = vmatmul.mubr.f32.vlgmr.msra.gmra.mxu0 %v2259_v47 }
  0x84   :  { %1717 = vmatpush3.xpose.msra.mxu1 %v2239_v30  ;;  %1724 = vmatpush3.xpose.msra.mxu0 %v148_v13  ;;  %v2469_v13 = vand.u32 4294901760, %v712_v10 }
  0x85   :  { %1718 = vmatprep.subr.mxu1 %v2005_v0  ;;  %1725 = vmatprep.subr.mxu0 %v2005_v0 }
  0x86   :  { %1755 = vmatprep.mubr.msk.f32.mxu0 %vm2006_vm0, %v2005_v0  ;;  %v2482_v20 = vsub.f32 %v712_v10, %v2469_v13 }
  0x88   :  { %1719 = vmatpush3.xpose.msra.mxu1 %v2256_v44  ;;  %1726 = vmatpush3.xpose.msra.mxu0 %v155_v14 }
  0x89   :  { %1727 = vmatprep.subr.mxu0 %v2005_v0  ;;  %1758 = vmatprep.subr.mxu1 %v2005_v0 }
  0x8b   :  { %1721 = vmatmul.mubr.f32.vlgmr.msra.gmra.mxu1 %v137_v56  ;;  %v704_v56 = vld [vmem:[%s2881_s3 + $0x28] sm:$0xff] }
  0x8c   :  { %1728 = vmatpush3.xpose.msra.mxu0 %v162_v18  ;;  %1759 = vmatpush3.xpose.msra.mxu1 %v2053_v4  ;;  %v714_v4 = vld [vmem:[%s2881_s3 + $0x78] sm:$0xff]  ;;  %v2597_v2 = vand.u32 4294901760, %v704_v56 }
  0x8d   :  { %1729 = vmatprep.subr.mxu0 %v2005_v0  ;;  %1760 = vmatprep.subr.mxu1 %v2005_v0 }
  0x8e   :  { %1790 = vmatprep.mubr.msk.f32.mxu1 %vm2006_vm0, %v2005_v0  ;;  %v2609_v24 = vsub.f32 %v704_v56, %v2597_v2 }
  0x90   :  { %1730 = vmatpush3.xpose.msra.mxu0 %v169_v25  ;;  %1761 = vmatpush3.xpose.msra.mxu1 %v2055_v5  ;;  %v2443_v5 = vand.u32 4294901760, %v714_v4 }
  0x91   :  { %1731 = vmatprep.subr.mxu0 %v2005_v0  ;;  %1762 = vmatprep.subr.mxu1 %v2005_v0 }
  0x94   :  { %1732 = vmatpush3.xpose.msra.mxu0 %v176_v31  ;;  %1763 = vmatpush3.xpose.msra.mxu1 %v2057_v6  ;;  %v713_v6 = vld [vmem:[%s2881_s3 + $0x70] sm:$0xff] }
  0x95   :  { %1733 = vmatprep.subr.mxu0 %v2005_v0  ;;  %1764 = vmatprep.subr.mxu1 %v2005_v0  ;;  %v2450_v8 = vand.u32 4294901760, %v713_v6 }
  0x97   :  { %v2464_v12 = vsub.f32 %v713_v6, %v2450_v8  ;;  %v867_v6 = vand.u32 4294901760, %v866_v29 }
  0x98   :  { %1734 = vmatpush3.xpose.msra.mxu0 %v183_v37  ;;  %1765 = vmatpush3.xpose.msra.mxu1 %v2070_v9  ;;  %v2456_v9 = vsub.f32 %v714_v4, %v2443_v5  ;;  %v823_v37 = vand.u32 4294901760, %v2482_v20  ;;  %v2621_v4 = vsub.f32 %v703_v11, %v2605_v19 }
  0x99   :  { %1735 = vmatprep.subr.mxu0 %v2005_v0  ;;  %1766 = vmatprep.subr.mxu1 %v2005_v0  ;;  %v816_v18 = vand.u32 4294901760, %v2464_v12 }
  0x9a   :  { %v809_v14 = vand.u32 4294901760, %v2456_v9  ;;  %v824_v45 = vsub.f32 %v2482_v20, %v823_v37 }
  0x9c   :  { %1736 = vmatpush3.xpose.msra.mxu0 %v190_v43  ;;  %1767 = vmatpush3.xpose.msra.mxu1 %v2084_v15  ;;  %v711_v15 = vld [vmem:[%s2881_s3 + $0x60] sm:$0xff] }
  0x9d   :  { %1737 = vmatprep.subr.mxu0 %v2005_v0  ;;  %1768 = vmatprep.subr.mxu1 %v2005_v0  ;;  %v2487_v25 = vand.u32 4294901760, %v711_v15 }
  0x9f   :  { %v2502_v33 = vsub.f32 %v711_v15, %v2487_v25  ;;  %v2627_v15 = vand.u32 4294901760, %v702_v36 }
  0xa0   :  { %1738 = vmatpush3.xpose.msra.mxu0 %v197_v49  ;;  %1769 = vmatpush3.xpose.msra.mxu1 %v2101_v22  ;;  %v810_v22 = vsub.f32 %v2456_v9, %v809_v14 }
  0xa1   :  { %1739 = vmatprep.subr.mxu0 %v2005_v0  ;;  %1770 = vmatprep.subr.mxu1 %v2005_v0  ;;  %v830_v49 = vand.u32 4294901760, %v2502_v33 }
  0xa2   :  { %v811_v31 = vand.u32 4294901760, %v810_v22  ;;  %v879_v22 = vand.u32 4294901760, %v2609_v24 }
  0xa4   :  { %1740 = vmatpush3.xpose.msra.mxu0 %v204_v55  ;;  %1771 = vmatpush3.xpose.msra.mxu1 %v2116_v28  ;;  %v817_v28 = vsub.f32 %v2464_v12, %v816_v18  ;;  %v825_v55 = vand.u32 4294901760, %v824_v45 }
  0xa5   :  { %1741 = vmatprep.subr.mxu0 %v2005_v0  ;;  %1772 = vmatprep.subr.mxu1 %v2005_v0 }
  0xa8   :  { %1742 = vmatpush3.xpose.msra.mxu0 %v211_v61  ;;  %1773 = vmatpush3.xpose.msra.mxu1 %v2131_v34  ;;  %v2504_v34 = vand.u32 4294901760, %v710_v27 }
  0xa9   :  { %1743 = vmatprep.subr.mxu0 %v2005_v0  ;;  %1774 = vmatprep.subr.mxu1 %v2005_v0 }
  0xaa   :  { %v2515_v43 = vsub.f32 %v710_v27, %v2504_v34  ;;  %v701_v27 = vld [vmem:[%s2881_s3 + $0x10] sm:$0xff] }
  0xab   :  { %v2643_v45 = vand.u32 4294901760, %v701_v27 }
  0xac   :  { %1744 = vmatpush3.xpose.msra.mxu0 %v218_v7  ;;  %1775 = vmatpush3.xpose.msra.mxu1 %v2146_v40  ;;  %v818_v40 = vand.u32 4294901760, %v817_v28  ;;  %v837_v61 = vand.u32 4294901760, %v2515_v43  ;;  %v886_v28 = vand.u32 4294901760, %v2621_v4 }
  0xad   :  { %1745 = vmatprep.subr.mxu0 %v2005_v0  ;;  %1776 = vmatprep.subr.mxu1 %v2005_v0 }
  0xae   :  { %v838_v16 = vsub.f32 %v2515_v43, %v837_v61 }
  0xb0   :  { %1746 = vmatpush3.xpose.msra.mxu0 %v225_v23  ;;  %1777 = vmatpush3.xpose.msra.mxu1 %v2161_v46  ;;  %v2520_v46 = vand.u32 4294901760, %v709_v39 }
  0xb1   :  { %1747 = vmatprep.subr.mxu0 %v2005_v0  ;;  %1778 = vmatprep.subr.mxu1 %v2005_v0 }
  0xb2   :  { %v2534_v57 = vsub.f32 %v709_v39, %v2520_v46  ;;  %v2638_v39 = vsub.f32 %v702_v36, %v2627_v15 }
  0xb4   :  { %1748 = vmatpush3.xpose.msra.mxu0 %v232_v38  ;;  %1779 = vmatpush3.xpose.msra.mxu1 %v2176_v52  ;;  %v2530_v52 = vand.u32 4294901760, %v708_v51  ;;  %v844_v23 = vand.u32 4294901760, %v2534_v57 }
  0xb5   :  { %1749 = vmatprep.subr.mxu0 %v2005_v0  ;;  %1780 = vmatprep.subr.mxu1 %v2005_v0 }
  0xb6   :  { %v845_v41 = vsub.f32 %v2534_v57, %v844_v23 }
  0xb8   :  { %1750 = vmatpush3.xpose.msra.mxu0 %v239_v53  ;;  %1781 = vmatpush3.xpose.msra.mxu1 %v2191_v58  ;;  %v831_v58 = vsub.f32 %v2502_v33, %v830_v49  ;;  %v846_v48 = vand.u32 4294901760, %v845_v41  ;;  %v699_v41 = vld [vmem:[%s2881_s3] sm:$0xff] }
  0xb9   :  { %1751 = vmatprep.subr.mxu0 %v2005_v0  ;;  %1782 = vmatprep.subr.mxu1 %v2005_v0 }
  0xba   :  { %v832_v7 = vand.u32 4294901760, %v831_v58  ;;  %v887_v58 = vsub.f32 %v2621_v4, %v886_v28 }
  0xbc   :  { %1752 = vmatpush3.xpose.msra.mxu0 %v246_v62  ;;  %1783 = vmatpush3.xpose.msra.mxu1 %v2206_v1  ;;  %v2546_v1 = vsub.f32 %v708_v51, %v2530_v52  ;;  %v698_v51 = vld [vmem:[%s2882_s1] sm:$0xff] }
  0xbd   :  { %1753 = vmatprep.subr.mxu0 %v2005_v0  ;;  %1784 = vmatprep.subr.mxu1 %v2005_v0 }
  0xc0   :  { %1754 = vmatpush3.xpose.msra.mxu0 %v253_v21  ;;  %1785 = vmatpush3.xpose.msra.mxu1 %v2221_v17  ;;  %v2552_v17 = vand.u32 4294901760, %v707_v63 }
  0xc1   :  { %1786 = vmatprep.subr.mxu1 %v2005_v0  ;;  %1793 = vmatprep.subr.mxu0 %v2005_v0 }
  0xc2   :  { %v2563_v38 = vsub.f32 %v707_v63, %v2552_v17  ;;  %v2656_v63 = vand.u32 4294901760, %v698_v51 }
  0xc3   :  { %1756 = vmatmul.mubr.f32.vlgmr.msra.gmra.mxu0 %v2241_v32 }
  0xc4   :  { %1787 = vmatpush3.xpose.msra.mxu1 %v2239_v30  ;;  %1794 = vmatpush3.xpose.msra.mxu0 %v2443_v5  ;;  %v851_v30 = vand.u32 4294901760, %v2546_v1  ;;  %v858_v54 = vand.u32 4294901760, %v2563_v38 }
  0xc5   :  { %1788 = vmatprep.subr.mxu1 %v2005_v0  ;;  %1795 = vmatprep.subr.mxu0 %v2005_v0 }
  0xc6   :  { %1825 = vmatprep.mubr.msk.f32.mxu0 %vm2006_vm0, %v2005_v0  ;;  %v852_v47 = vsub.f32 %v2546_v1, %v851_v30  ;;  %v859_v62 = vsub.f32 %v2563_v38, %v858_v54 }
  0xc8   :  { %1789 = vmatpush3.xpose.msra.mxu1 %v2256_v44  ;;  %1796 = vmatpush3.xpose.msra.mxu0 %v2450_v8  ;;  %v705_v44 = vld [vmem:[%s2881_s3 + $0x30] sm:$0xff]  ;;  %v853_v59 = vand.u32 4294901760, %v852_v47  ;;  %v860_v21 = vand.u32 4294901760, %v859_v62  ;;  %v2671_v47 = vsub.f32 %v698_v51, %v2656_v63 }
  0xc9   :  { %1797 = vmatprep.subr.mxu0 %v2005_v0  ;;  %1828 = vmatprep.subr.mxu1 %v2005_v0  ;;  %v2582_v53 = vand.u32 4294901760, %v705_v44 }
  0xca   :  { %v798_v11 = vand.u32 4294901760, %v2671_v47 }
  0xcb   :  { %1791 = vmatmul.mubr.f32.vlgmr.msra.gmra.mxu1 %v2241_v32  ;;  %v839_v32 = vand.u32 4294901760, %v838_v16  ;;  %v2592_v60 = vsub.f32 %v705_v44, %v2582_v53  ;;  %v2660_v16 = vsub.f32 %v701_v27, %v2643_v45  ;;  %v888_v44 = vand.u32 4294901760, %v887_v58 }
  0xcc   :  { %1798 = vmatpush3.xpose.msra.mxu0 %v2469_v13  ;;  %1829 = vmatpush3.xpose.msra.mxu1 %v811_v31 }
  0xcd   :  { %1799 = vmatprep.subr.mxu0 %v2005_v0  ;;  %1830 = vmatprep.subr.mxu1 %v2005_v0  ;;  %v872_v35 = vand.u32 4294901760, %v2592_v60  ;;  %v900_v62 = vand.u32 4294901760, %v2660_v16 }
  0xce   :  { %1860 = vmatprep.mubr.msk.f32.mxu1 %vm2006_vm0, %v2005_v0 }
  0xcf   :  { %v873_v10 = vsub.f32 %v2592_v60, %v872_v35  ;;  %v901_v36 = vsub.f32 %v2660_v16, %v900_v62 }
  0xd0   :  { %1800 = vmatpush3.xpose.msra.mxu0 %v2487_v25  ;;  %1831 = vmatpush3.xpose.msra.mxu1 %v818_v40  ;;  %v880_v40 = vsub.f32 %v2609_v24, %v879_v22 }
  0xd1   :  { %1801 = vmatprep.subr.mxu0 %v2005_v0  ;;  %1832 = vmatprep.subr.mxu1 %v2005_v0  ;;  %v874_v31 = vand.u32 4294901760, %v873_v10  ;;  %v799_v10 = vsub.f32 %v2671_v47, %v798_v11  ;;  %v902_v27 = vand.u32 4294901760, %v901_v36 }
  0xd3   :  { %v800_v51 = vand.u32 4294901760, %v799_v10 }
  0xd4   :  { %1802 = vmatpush3.xpose.msra.mxu0 %v2504_v34  ;;  %1833 = vmatpush3.xpose.msra.mxu1 %v825_v55  ;;  %v700_v55 = vld [vmem:[%s2881_s3 + $0x8] sm:$0xff] }
  0xd5   :  { %1803 = vmatprep.subr.mxu0 %v2005_v0  ;;  %1834 = vmatprep.subr.mxu1 %v2005_v0  ;;  %v2662_v26 = vand.u32 4294901760, %v700_v55 }
  0xd8   :  { %1804 = vmatpush3.xpose.msra.mxu0 %v2520_v46  ;;  %1835 = vmatpush3.xpose.msra.mxu1 %v832_v7  ;;  %v881_v7 = vand.u32 4294901760, %v880_v40 }
  0xd9   :  { %1805 = vmatprep.subr.mxu0 %v2005_v0  ;;  %1836 = vmatprep.subr.mxu1 %v2005_v0 }
  0xdc   :  { %1806 = vmatpush3.xpose.msra.mxu0 %v2530_v52  ;;  %1837 = vmatpush3.xpose.msra.mxu1 %v839_v32  ;;  %v893_v32 = vand.u32 4294901760, %v2638_v39 }
  0xdd   :  { %1807 = vmatprep.subr.mxu0 %v2005_v0  ;;  %1838 = vmatprep.subr.mxu1 %v2005_v0 }
  0xde   :  { %v894_v56 = vsub.f32 %v2638_v39, %v893_v32 }
  0xe0   :  { %1808 = vmatpush3.xpose.msra.mxu0 %v2552_v17  ;;  %1839 = vmatpush3.xpose.msra.mxu1 %v846_v48  ;;  %v2675_v48 = vsub.f32 %v700_v55, %v2662_v26 }
  0xe1   :  { %1809 = vmatprep.subr.mxu0 %v2005_v0  ;;  %1840 = vmatprep.subr.mxu1 %v2005_v0 }
  0xe4   :  { %1810 = vmatpush3.xpose.msra.mxu0 %v2568_v42  ;;  %1841 = vmatpush3.xpose.msra.mxu1 %v853_v59  ;;  %v2680_v59 = vand.u32 4294901760, %v699_v41 }
  0xe5   :  { %1811 = vmatprep.subr.mxu0 %v2005_v0  ;;  %1842 = vmatprep.subr.mxu1 %v2005_v0 }
  0xe6   :  { %v2688_v29 = vsub.f32 %v699_v41, %v2680_v59 }
  0xe8   :  { %1812 = vmatpush3.xpose.msra.mxu0 %v2582_v53  ;;  %1843 = vmatpush3.xpose.msra.mxu1 %v860_v21  ;;  %v895_v21 = vand.u32 4294901760, %v894_v56  ;;  %v914_v40 = vand.u32 4294901760, %v2688_v29 }
  0xe9   :  { %1813 = vmatprep.subr.mxu0 %v2005_v0  ;;  %1844 = vmatprep.subr.mxu1 %v2005_v0 }
  0xea   :  { %v915_v58 = vsub.f32 %v2688_v29, %v914_v40 }
  0xec   :  { %1814 = vmatpush3.xpose.msra.mxu0 %v2597_v2  ;;  %1845 = vmatpush3.xpose.msra.mxu1 %v867_v6  ;;  %v907_v6 = vand.u32 4294901760, %v2675_v48  ;;  %v916_v41 = vand.u32 4294901760, %v915_v58 }
  0xed   :  { %1815 = vmatprep.subr.mxu0 %v2005_v0  ;;  %1846 = vmatprep.subr.mxu1 %v2005_v0 }
  0xf0   :  { %1816 = vmatpush3.xpose.msra.mxu0 %v2605_v19  ;;  %1847 = vmatpush3.xpose.msra.mxu1 %v874_v31  ;;  %v908_v31 = vsub.f32 %v2675_v48, %v907_v6 }
  0xf1   :  { %1817 = vmatprep.subr.mxu0 %v2005_v0  ;;  %1848 = vmatprep.subr.mxu1 %v2005_v0 }
  0xf2   :  { %v909_v55 = vand.u32 4294901760, %v908_v31 }
  0xf4   :  { %1818 = vmatpush3.xpose.msra.mxu0 %v2627_v15  ;;  %1849 = vmatpush3.xpose.msra.mxu1 %v881_v7 }
  0xf5   :  { %1819 = vmatprep.subr.mxu0 %v2005_v0  ;;  %1850 = vmatprep.subr.mxu1 %v2005_v0 }
  0xf8   :  { %1820 = vmatpush3.xpose.msra.mxu0 %v2643_v45  ;;  %1851 = vmatpush3.xpose.msra.mxu1 %v888_v44 }
  0xf9   :  { %1821 = vmatprep.subr.mxu0 %v2005_v0  ;;  %1852 = vmatprep.subr.mxu1 %v2005_v0 }
  0xfc   :  { %1822 = vmatpush3.xpose.msra.mxu0 %v2662_v26  ;;  %1853 = vmatpush3.xpose.msra.mxu1 %v895_v21 }
  0xfd   :  { %1823 = vmatprep.subr.mxu0 %v2005_v0  ;;  %1854 = vmatprep.subr.mxu1 %v2005_v0 }
 0x100   :  { %1824 = vmatpush3.xpose.msra.mxu0 %v2680_v59  ;;  %1855 = vmatpush3.xpose.msra.mxu1 %v902_v27 }
 0x101   :  { %1856 = vmatprep.subr.mxu1 %v2005_v0  ;;  %1863 = vmatprep.subr.mxu0 %v2005_v0 }
 0x103   :  { %1826 = vmatmul.mubr.f32.vlgmr.msra.gmra.mxu0 %v800_v51  ;;  %v141_v7 = vpop.f32.mrf.mxu0 }
 0x104   :  { %1857 = vmatpush3.xpose.msra.mxu1 %v909_v55  ;;  %1864 = vmatpush3.xpose.msra.mxu0 %v2456_v9 }
 0x105   :  { %1858 = vmatprep.subr.mxu1 %v2005_v0  ;;  %1865 = vmatprep.subr.mxu0 %v2005_v0  ;;  %v1617_v44 = vpop.f32.mrf.mxu0 }
 0x106   :  { %1895 = vmatprep.mubr.msk.f32.mxu0 %vm2006_vm0, %v2005_v0 }
 0x108   :  { %1859 = vmatpush3.xpose.msra.mxu1 %v916_v41  ;;  %1866 = vmatpush3.xpose.msra.mxu0 %v2464_v12 }
 0x109   :  { %1867 = vmatprep.subr.mxu0 %v2005_v0  ;;  %1898 = vmatprep.subr.mxu1 %v2005_v0 }
 0x10b   :  { %v292_v56 = vpop.f32.mrf.mxu1  ;;  %1861 = vmatmul.mubr.f32.vlgmr.msra.gmra.mxu1 %v2656_v63 }
 0x10c   :  { %v293_v21 = vadd.f32 %v292_v56, %v141_v7  ;;  %1868 = vmatpush3.xpose.msra.mxu0 %v2482_v20  ;;  %1899 = vmatpush3.xpose.msra.mxu1 %v2443_v5 }
 0x10d   :  { %v1652_v36 = vpop.f32.mrf.mxu1  ;;  %1869 = vmatprep.subr.mxu0 %v2005_v0  ;;  %1900 = vmatprep.subr.mxu1 %v2005_v0 }
 0x10e   :  { %1930 = vmatprep.mubr.msk.f32.mxu1 %vm2006_vm0, %v2005_v0 }
 0x110   :  { %1870 = vmatpush3.xpose.msra.mxu0 %v2502_v33  ;;  %1901 = vmatpush3.xpose.msra.mxu1 %v2450_v8 }
 0x111   :  { %1871 = vmatprep.subr.mxu0 %v2005_v0  ;;  %1902 = vmatprep.subr.mxu1 %v2005_v0 }
 0x114   :  { %1872 = vmatpush3.xpose.msra.mxu0 %v2515_v43  ;;  %1903 = vmatpush3.xpose.msra.mxu1 %v2469_v13 }
 0x115   :  { %1873 = vmatprep.subr.mxu0 %v2005_v0  ;;  %1904 = vmatprep.subr.mxu1 %v2005_v0 }
 0x118   :  { %1874 = vmatpush3.xpose.msra.mxu0 %v2534_v57  ;;  %1905 = vmatpush3.xpose.msra.mxu1 %v2487_v25 }
 0x119   :  { %1875 = vmatprep.subr.mxu0 %v2005_v0  ;;  %1906 = vmatprep.subr.mxu1 %v2005_v0 }
 0x11c   :  { %1876 = vmatpush3.xpose.msra.mxu0 %v2546_v1  ;;  %1907 = vmatpush3.xpose.msra.mxu1 %v2504_v34 }
 0x11d   :  { %1877 = vmatprep.subr.mxu0 %v2005_v0  ;;  %1908 = vmatprep.subr.mxu1 %v2005_v0 }
 0x120   :  { %1878 = vmatpush3.xpose.msra.mxu0 %v2563_v38  ;;  %1909 = vmatpush3.xpose.msra.mxu1 %v2520_v46 }
 0x121   :  { %1879 = vmatprep.subr.mxu0 %v2005_v0  ;;  %1910 = vmatprep.subr.mxu1 %v2005_v0 }
 0x124   :  { %1880 = vmatpush3.xpose.msra.mxu0 %v2580_v50  ;;  %1911 = vmatpush3.xpose.msra.mxu1 %v2530_v52 }
 0x125   :  { %1881 = vmatprep.subr.mxu0 %v2005_v0  ;;  %1912 = vmatprep.subr.mxu1 %v2005_v0 }
 0x128   :  { %1882 = vmatpush3.xpose.msra.mxu0 %v2592_v60  ;;  %1913 = vmatpush3.xpose.msra.mxu1 %v2552_v17 }
 0x129   :  { %1883 = vmatprep.subr.mxu0 %v2005_v0  ;;  %1914 = vmatprep.subr.mxu1 %v2005_v0 }
 0x12c   :  { %1884 = vmatpush3.xpose.msra.mxu0 %v2609_v24  ;;  %1915 = vmatpush3.xpose.msra.mxu1 %v2568_v42 }
 0x12d   :  { %1885 = vmatprep.subr.mxu0 %v2005_v0  ;;  %1916 = vmatprep.subr.mxu1 %v2005_v0 }
 0x130   :  { %1886 = vmatpush3.xpose.msra.mxu0 %v2621_v4  ;;  %1917 = vmatpush3.xpose.msra.mxu1 %v2582_v53 }
 0x131   :  { %1887 = vmatprep.subr.mxu0 %v2005_v0  ;;  %1918 = vmatprep.subr.mxu1 %v2005_v0 }
 0x134   :  { %1888 = vmatpush3.xpose.msra.mxu0 %v2638_v39  ;;  %1919 = vmatpush3.xpose.msra.mxu1 %v2597_v2 }
 0x135   :  { %1889 = vmatprep.subr.mxu0 %v2005_v0  ;;  %1920 = vmatprep.subr.mxu1 %v2005_v0 }
 0x138   :  { %1890 = vmatpush3.xpose.msra.mxu0 %v2660_v16  ;;  %1921 = vmatpush3.xpose.msra.mxu1 %v2605_v19 }
 0x139   :  { %1891 = vmatprep.subr.mxu0 %v2005_v0  ;;  %1922 = vmatprep.subr.mxu1 %v2005_v0 }
 0x13c   :  { %1892 = vmatpush3.xpose.msra.mxu0 %v2675_v48  ;;  %1923 = vmatpush3.xpose.msra.mxu1 %v2627_v15 }
 0x13d   :  { %1893 = vmatprep.subr.mxu0 %v2005_v0  ;;  %1924 = vmatprep.subr.mxu1 %v2005_v0 }
 0x140   :  { %1894 = vmatpush3.xpose.msra.mxu0 %v2688_v29  ;;  %1925 = vmatpush3.xpose.msra.mxu1 %v2643_v45 }
 0x141   :  { %1926 = vmatprep.subr.mxu1 %v2005_v0  ;;  %1933 = vmatprep.subr.mxu0 %v2005_v0 }
 0x143   :  { %v396_v10 = vpop.f32.mrf.mxu0  ;;  %1896 = vmatmul.mubr.f32.vlgmr.msra.gmra.mxu0 %v2671_v47 }
 0x144   :  { %v397_v27 = vadd.f32 %v396_v10, %v293_v21  ;;  %1927 = vmatpush3.xpose.msra.mxu1 %v2662_v26  ;;  %1934 = vmatpush3.xpose.msra.mxu0 %v809_v14 }
 0x145   :  { %1928 = vmatprep.subr.mxu1 %v2005_v0  ;;  %1935 = vmatprep.subr.mxu0 %v2005_v0  ;;  %v1687_v31 = vpop.f32.mrf.mxu0 }
 0x146   :  { %1965 = vmatprep.mubr.msk.f32.mxu0 %vm2006_vm0, %v2005_v0 }
 0x148   :  { %1929 = vmatpush3.xpose.msra.mxu1 %v2680_v59  ;;  %1936 = vmatpush3.xpose.msra.mxu0 %v816_v18 }
 0x149   :  { %1937 = vmatprep.subr.mxu0 %v2005_v0  ;;  %1968 = vmatprep.subr.mxu1 %v2005_v0 }
 0x14b   :  { %v485_v51 = vpop.f32.mrf.mxu1  ;;  %1931 = vmatmul.mubr.f32.vlgmr.msra.gmra.mxu1 %v798_v11 }
 0x14c   :  { %v486_v9 = vadd.f32 %v485_v51, %v397_v27  ;;  %1938 = vmatpush3.xpose.msra.mxu0 %v823_v37  ;;  %1969 = vmatpush3.xpose.msra.mxu1 %v2443_v5 }
 0x14d   :  { %v1722_v14 = vpop.f32.mrf.mxu1  ;;  %1939 = vmatprep.subr.mxu0 %v2005_v0  ;;  %1970 = vmatprep.subr.mxu1 %v2005_v0 }
 0x14e   :  { %2000 = vmatprep.mubr.msk.f32.mxu1 %vm2006_vm0, %v2005_v0 }
 0x150   :  { %1940 = vmatpush3.xpose.msra.mxu0 %v830_v49  ;;  %1971 = vmatpush3.xpose.msra.mxu1 %v2450_v8 }
 0x151   :  { %1941 = vmatprep.subr.mxu0 %v2005_v0  ;;  %1972 = vmatprep.subr.mxu1 %v2005_v0 }
 0x154   :  { %1942 = vmatpush3.xpose.msra.mxu0 %v837_v61  ;;  %1973 = vmatpush3.xpose.msra.mxu1 %v2469_v13 }
 0x155   :  { %1943 = vmatprep.subr.mxu0 %v2005_v0  ;;  %1974 = vmatprep.subr.mxu1 %v2005_v0 }
 0x158   :  { %1944 = vmatpush3.xpose.msra.mxu0 %v844_v23  ;;  %1975 = vmatpush3.xpose.msra.mxu1 %v2487_v25 }
 0x159   :  { %1945 = vmatprep.subr.mxu0 %v2005_v0  ;;  %1976 = vmatprep.subr.mxu1 %v2005_v0 }
 0x15c   :  { %1946 = vmatpush3.xpose.msra.mxu0 %v851_v30  ;;  %1977 = vmatpush3.xpose.msra.mxu1 %v2504_v34  ;;  %v1377_v30 = vld [vmem:[%s2883_s4] ss:$0 sm:$0xff] }
 0x15d   :  { %1947 = vmatprep.subr.mxu0 %v2005_v0  ;;  %1978 = vmatprep.subr.mxu1 %v2005_v0 }
 0x160   :  { %1948 = vmatpush3.xpose.msra.mxu0 %v858_v54  ;;  %1979 = vmatpush3.xpose.msra.mxu1 %v2520_v46 }
 0x161   :  { %1949 = vmatprep.subr.mxu0 %v2005_v0  ;;  %1980 = vmatprep.subr.mxu1 %v2005_v0 }
 0x164   :  { %1950 = vmatpush3.xpose.msra.mxu0 %v865_v3  ;;  %1981 = vmatpush3.xpose.msra.mxu1 %v2530_v52 }
 0x165   :  { %1951 = vmatprep.subr.mxu0 %v2005_v0  ;;  %1982 = vmatprep.subr.mxu1 %v2005_v0 }
 0x168   :  { %1952 = vmatpush3.xpose.msra.mxu0 %v872_v35  ;;  %1983 = vmatpush3.xpose.msra.mxu1 %v2552_v17 }
 0x169   :  { %1953 = vmatprep.subr.mxu0 %v2005_v0  ;;  %1984 = vmatprep.subr.mxu1 %v2005_v0 }
 0x16c   :  { %1954 = vmatpush3.xpose.msra.mxu0 %v879_v22  ;;  %1985 = vmatpush3.xpose.msra.mxu1 %v2568_v42  ;;  %v1378_v42 = vld [vmem:[%s2884_s5] ss:$0 sm:$0xff] }
 0x16d   :  { %1955 = vmatprep.subr.mxu0 %v2005_v0  ;;  %1986 = vmatprep.subr.mxu1 %v2005_v0 }
 0x170   :  { %1956 = vmatpush3.xpose.msra.mxu0 %v886_v28  ;;  %1987 = vmatpush3.xpose.msra.mxu1 %v2582_v53 }
 0x171   :  { %1957 = vmatprep.subr.mxu0 %v2005_v0  ;;  %1988 = vmatprep.subr.mxu1 %v2005_v0 }
 0x174   :  { %1958 = vmatpush3.xpose.msra.mxu0 %v893_v32  ;;  %1989 = vmatpush3.xpose.msra.mxu1 %v2597_v2 }
 0x175   :  { %1959 = vmatprep.subr.mxu0 %v2005_v0  ;;  %1990 = vmatprep.subr.mxu1 %v2005_v0 }
 0x178   :  { %1960 = vmatpush3.xpose.msra.mxu0 %v900_v62  ;;  %1991 = vmatpush3.xpose.msra.mxu1 %v2605_v19 }
 0x179   :  { %1961 = vmatprep.subr.mxu0 %v2005_v0  ;;  %1992 = vmatprep.subr.mxu1 %v2005_v0 }
 0x17c   :  { %1962 = vmatpush3.xpose.msra.mxu0 %v907_v6  ;;  %1993 = vmatpush3.xpose.msra.mxu1 %v2627_v15 }
 0x17d   :  { %1963 = vmatprep.subr.mxu0 %v2005_v0  ;;  %1994 = vmatprep.subr.mxu1 %v2005_v0 }
 0x180   :  { %1964 = vmatpush3.xpose.msra.mxu0 %v914_v40  ;;  %1995 = vmatpush3.xpose.msra.mxu1 %v2643_v45 }
 0x181   :  { %1996 = vmatprep.subr.mxu1 %v2005_v0 }
 0x183   :  { %v604_v5 = vpop.f32.mrf.mxu0  ;;  %1966 = vmatmul.mubr.f32.vlgmr.msra.gmra.mxu0 %v2656_v63 }
 0x184   :  { %v605_v8 = vadd.f32 %v604_v5, %v486_v9  ;;  %1997 = vmatpush3.xpose.msra.mxu1 %v2662_v26 }
 0x185   :  { %1998 = vmatprep.subr.mxu1 %v2005_v0  ;;  %v1757_v12 = vpop.f32.mrf.mxu0 }
 0x188   :  { %1999 = vmatpush3.xpose.msra.mxu1 %v2680_v59 }
 0x18b   :  { %v691_v13 = vpop.f32.mrf.mxu1  ;;  %2001 = vmatmul.mubr.f32.vlgmr.msra.gmra.mxu1 %v2656_v63 }
 0x18c   :  { %v692_v18 = vadd.f32 %v691_v13, %v605_v8 }
 0x18d   :  { %v1792_v20 = vpop.f32.mrf.mxu1 }
 0x18e   :  { %v695_v54 = vadd.f32 %v1377_v30, %v692_v18 }
 0x1c3   :  { %v802_v25 = vpop.f32.mrf.mxu0 }
 0x1c5   :  { %v1827_v33 = vpop.f32.mrf.mxu0 }
 0x1cb   :  { %v953_v34 = vpop.f32.mrf.mxu1 }
 0x1cc   :  { %v954_v37 = vadd.f32 %v953_v34, %v802_v25 }
 0x1cd   :  { %v1862_v43 = vpop.f32.mrf.mxu1 }
 0x203   :  { %v1057_v46 = vpop.f32.mrf.mxu0 }
 0x204   :  { %v1058_v49 = vadd.f32 %v1057_v46, %v954_v37 }
 0x205   :  { %v1897_v52 = vpop.f32.mrf.mxu0 }
 0x20b   :  { %v1146_v57 = vpop.f32.mrf.mxu1 }
 0x20c   :  { %v1147_v17 = vadd.f32 %v1146_v57, %v1058_v49 }
 0x20d   :  { %v1932_v61 = vpop.f32.mrf.mxu1 }
 0x243   :  { %v1265_v1 = vpop.f32.mrf.mxu0 }
 0x244   :  { %v1266_v23 = vadd.f32 %v1265_v1, %v1147_v17 }
 0x245   :  { %v1967_v0 = vpop.f32.mrf.mxu0 }
 0x24b   :  { %v1352_v38 = vpop.f32.mrf.mxu1 }
 0x24c   :  { %v1353_v50 = vadd.f32 %v1352_v38, %v1266_v23 }
 0x24d   :  { %v2002_v53 = vpop.f32.mrf.mxu1 }
 0x24e   :  { %v1370_v60 = vmul.f32 %v1378_v42, %v1353_v50 }
 0x250   :  { %v1371_v2 = vadd.f32 %v1370_v60, %v695_v54 }
 0x252   :  { %1372 = vst [vmem:[%s2885_s6] sm:$0xff] %v1371_v2 }

</bundles_post_ra>
